<compile_context>
chip_gen: v7x
topology: tpu7x:2x2x1
jax: 0.10.0
libtpu: 0.0.40
codegen_flags: <defaults>
</compile_context>

<pallas_src>
import functools
import math

import jax
import jax.numpy as jnp
from jax import lax
from jax.experimental import pallas as pl
from jax.experimental.pallas import tpu as pltpu


_MASK_VALUE = -1e30
# Conservative scoped-VMEM limit: fits v7x's 64 MiB physical VMEM with headroom,
# and is far above what these tile sizes need on v5e/v6e.
_VMEM_LIMIT = 32 * 1024 * 1024


def _pick_tile(dim, target, multiple):
    """Largest tile <= target that divides `dim` and is a multiple of `multiple`.

    Falls back to the full dim (always a legal block shape)."""
    if dim <= target:
        return dim
    t = (target // multiple) * multiple
    while t >= multiple:
        if dim % t == 0:
            return t
        t -= multiple
    return dim


# ----------------------------- tiled linear (matmul) kernels -----------------
def _matmul_kernel(x_ref, w_ref, o_ref, acc_ref):
    @pl.when(pl.program_id(2) == 0)
    def _():
        acc_ref[...] = jnp.zeros_like(acc_ref)

    acc_ref[...] += jnp.dot(x_ref[...], w_ref[...],
                            preferred_element_type=jnp.float32)

    @pl.when(pl.program_id(2) == pl.num_programs(2) - 1)
    def _():
        o_ref[...] = acc_ref[...].astype(o_ref.dtype)


def _matmul_bias_kernel(x_ref, w_ref, b_ref, o_ref, acc_ref):
    @pl.when(pl.program_id(2) == 0)
    def _():
        acc_ref[...] = jnp.zeros_like(acc_ref)

    acc_ref[...] += jnp.dot(x_ref[...], w_ref[...],
                            preferred_element_type=jnp.float32)

    @pl.when(pl.program_id(2) == pl.num_programs(2) - 1)
    def _():
        o_ref[...] = (acc_ref[...] + b_ref[...].astype(jnp.float32)).astype(o_ref.dtype)


def linear_pallas(x2d, w, b=None, *, tm_target=256, tn_target=256, tk_target=512):
    """y = x2d @ w (+ b).  Tiled over (M, N, K) with a K-reduction pipeline."""
    M, K = x2d.shape
    K2, N = w.shape
    assert K == K2
    tm = _pick_tile(M, tm_target, 8)
    tn = _pick_tile(N, tn_target, 128)
    tk = _pick_tile(K, tk_target, 128)
    grid = (M // tm, N // tn, K // tk)

    in_specs = [
        pl.BlockSpec((tm, tk), lambda i, j, k: (i, k)),
        pl.BlockSpec((tk, tn), lambda i, j, k: (k, j)),
    ]
    args = [x2d, w]
    if b is not None:
        in_specs.append(pl.BlockSpec((1, tn), lambda i, j, k: (0, j)))
        args.append(b.reshape(1, N))
        kernel = _matmul_bias_kernel
    else:
        kernel = _matmul_kernel

    return pl.pallas_call(
        kernel,
        out_shape=jax.ShapeDtypeStruct((M, N), x2d.dtype),
        grid=grid,
        in_specs=in_specs,
        out_specs=pl.BlockSpec((tm, tn), lambda i, j, k: (i, j)),
        scratch_shapes=[pltpu.VMEM((tm, tn), jnp.float32)],
        compiler_params=pltpu.CompilerParams(
            dimension_semantics=("parallel", "parallel", "arbitrary"),
            vmem_limit_bytes=_VMEM_LIMIT),
    )(*args)


# --------------------- causal GQA flash-attention kernel ---------------------
def _rope(t, cos_f, sin_r):
    # t: (rows, Dh); cos_f = [cos|cos]; sin_r = [-sin|sin]  (both (rows, Dh))
    d2 = t.shape[-1] // 2
    t_rot = jnp.concatenate([t[:, d2:], t[:, :d2]], axis=-1)  # rotate_half
    return t * cos_f + t_rot * sin_r


def _flash_gqa_kernel(cos_q_ref, sin_q_ref, cos_k_ref, sin_k_ref,
                      q_ref, k_ref, v_ref, o_ref,
                      q_rot_ref, m_ref, l_ref, acc_ref, *, scale):
    _, tq, H, Dh = q_ref.shape
    _, tkv, Hkv, _ = k_ref.shape
    group = H // Hkv
    qi = pl.program_id(1)
    ki = pl.program_id(2)

    @pl.when(ki == 0)
    def _init():
        # RoPE(q) once per q tile (all heads), pre-scaled, cached in scratch.
        cos_q = cos_q_ref[...].astype(jnp.float32)
        sin_q = sin_q_ref[...].astype(jnp.float32)
        for h in range(H):
            q_h = q_ref[0, :, h, :].astype(jnp.float32)
            q_rot_ref[h] = (_rope(q_h, cos_q, sin_q) * scale).astype(q_rot_ref.dtype)
        m_ref[...] = jnp.full(m_ref.shape, _MASK_VALUE, m_ref.dtype)
        l_ref[...] = jnp.zeros_like(l_ref)
        acc_ref[...] = jnp.zeros_like(acc_ref)

    # Skip kv tiles that lie entirely above the causal diagonal (no compute;
    # the clamped index_map also suppresses their DMA).
    @pl.when(ki * tkv < (qi + 1) * tq)
    def _compute():
        cos_k = cos_k_ref[...].astype(jnp.float32)
        sin_k = sin_k_ref[...].astype(jnp.float32)
        rows = qi * tq + lax.broadcasted_iota(jnp.int32, (tq, tkv), 0)
        cols = ki * tkv + lax.broadcasted_iota(jnp.int32, (tq, tkv), 1)
        causal = cols <= rows                                   # tile-local mask

        for kh in range(Hkv):                                   # once per kv head
            k_h = k_ref[0, :, kh, :].astype(jnp.float32)
            k_h = _rope(k_h, cos_k, sin_k).astype(k_ref.dtype)  # RoPE(k) once/group
            v_h = v_ref[0, :, kh, :]
            for g in range(group):                              # q heads sharing k/v
                h = kh * group + g
                s = lax.dot_general(q_rot_ref[h], k_h,
                                    (((1,), (1,)), ((), ())),
                                    preferred_element_type=jnp.float32)   # (tq, tkv)
                s = jnp.where(causal, s, _MASK_VALUE)
                m_prev = m_ref[h]                                          # (tq, 1)
                m_new = jnp.maximum(m_prev, jnp.max(s, axis=-1, keepdims=True))
                alpha = jnp.exp(m_prev - m_new)
                p = jnp.exp(s - m_new)
                l_ref[h] = alpha * l_ref[h] + jnp.sum(p, axis=-1, keepdims=True)
                acc_ref[h] = alpha * acc_ref[h] + jnp.dot(
                    p.astype(v_h.dtype), v_h, preferred_element_type=jnp.float32)
                m_ref[h] = m_new

    @pl.when(ki == pl.num_programs(2) - 1)
    def _finalize():
        for h in range(H):
            inv_l = pl.reciprocal(l_ref[h], approx=True)
            o_ref[0, :, h, :] = (acc_ref[h] * inv_l).astype(o_ref.dtype)


def attention_forward(x, wqkv, bqkv, wo, cos, sin, *,
                      n_heads, n_kv_heads, head_dim, q_block=128, kv_block=128):
    B, S, D = x.shape
    H, Hkv, Dh = n_heads, n_kv_heads, head_dim
    assert H % Hkv == 0

    # qkv projection (tiled Pallas matmul with fused bias).
    qkv = linear_pallas(x.reshape(B * S, D), wqkv, bqkv)        # (B*S, (H+2Hkv)*Dh)
    qkv = qkv.reshape(B, S, H + 2 * Hkv, Dh)
    # Head-major slices, (B, S, h, Dh) layout — no transposes; the attention
    # kernel indexes heads inside the block and writes (B, S, H, Dh) back.
    q = qkv[:, :, :H]
    k = qkv[:, :, H:H + Hkv]
    v = qkv[:, :, H + Hkv:]

    # RoPE tables pre-expanded to full head_dim (rotate-half form):
    #   rope(t) = t * [cos|cos] + rotate_half(t) * [-sin|sin]
    cos_f = jnp.concatenate([cos, cos], axis=-1).astype(jnp.float32)   # (S, Dh)
    sin_r = jnp.concatenate([-sin, sin], axis=-1).astype(jnp.float32)  # (S, Dh)

    tq = _pick_tile(S, q_block, 8)
    tkv = _pick_tile(S, kv_block, 8)
    nq, nkv = S // tq, S // tkv

    def kv_clamp(qi, ki):
        # Last kv tile intersecting the causal region of q tile `qi`; masked
        # tiles re-use the previous block index so their DMA is skipped.
        return jnp.minimum(ki, ((qi + 1) * tq - 1) // tkv)

    kernel = functools.partial(_flash_gqa_kernel, scale=1.0 / math.sqrt(Dh))
    out = pl.pallas_call(
        kernel,
        out_shape=jax.ShapeDtypeStruct((B, S, H, Dh), x.dtype),
        grid=(B, nq, nkv),
        in_specs=[
            pl.BlockSpec((tq, Dh), lambda b, qi, ki: (qi, 0)),                 # cos (q rows)
            pl.BlockSpec((tq, Dh), lambda b, qi, ki: (qi, 0)),                 # sin (q rows)
            pl.BlockSpec((tkv, Dh), lambda b, qi, ki: (kv_clamp(qi, ki), 0)),  # cos (k rows)
            pl.BlockSpec((tkv, Dh), lambda b, qi, ki: (kv_clamp(qi, ki), 0)),  # sin (k rows)
            pl.BlockSpec((1, tq, H, Dh), lambda b, qi, ki: (b, qi, 0, 0)),     # q
            pl.BlockSpec((1, tkv, Hkv, Dh),
                         lambda b, qi, ki: (b, kv_clamp(qi, ki), 0, 0)),       # k
            pl.BlockSpec((1, tkv, Hkv, Dh),
                         lambda b, qi, ki: (b, kv_clamp(qi, ki), 0, 0)),       # v
        ],
        out_specs=pl.BlockSpec((1, tq, H, Dh), lambda b, qi, ki: (b, qi, 0, 0)),
        scratch_shapes=[
            pltpu.VMEM((H, tq, Dh), x.dtype),       # RoPE'd, pre-scaled q
            pltpu.VMEM((H, tq, 1), jnp.float32),    # running max  m
            pltpu.VMEM((H, tq, 1), jnp.float32),    # running sum  l
            pltpu.VMEM((H, tq, Dh), jnp.float32),   # output accumulator
        ],
        compiler_params=pltpu.CompilerParams(
            dimension_semantics=("parallel", "parallel", "arbitrary"),
            vmem_limit_bytes=_VMEM_LIMIT),
    )(cos_f, sin_r, cos_f, sin_r, q, k, v)

    # '(b n) h d -> b n (h d)' is a free reshape in this layout; o_proj has no bias.
    out2d = out.reshape(B * S, H * Dh)
    o = linear_pallas(out2d, wo)
    return o.reshape(B, S, D)


# --------------------------- pure-JAX reference ------------------------------
def attention_reference(x, wqkv, bqkv, wo, cos, sin, *, n_heads, n_kv_heads, head_dim):
    B, S, D = x.shape
    H, Hkv, Dh = n_heads, n_kv_heads, head_dim
    qkv = x.reshape(B * S, D) @ wqkv + bqkv
    qkv = qkv.reshape(B, S, H + 2 * Hkv, Dh)
    q, k, v = qkv[:, :, :H], qkv[:, :, H:H + Hkv], qkv[:, :, H + Hkv:]

    def rope(t):
        t1, t2 = t[..., :Dh // 2], t[..., Dh // 2:]
        c = cos[None, :, None, :]
        s = sin[None, :, None, :]
        return jnp.concatenate([t1 * c - t2 * s, t1 * s + t2 * c], axis=-1)

    q, k = rope(q), rope(k)
    k = jnp.repeat(k, H // Hkv, axis=2)
    v = jnp.repeat(v, H // Hkv, axis=2)
    scores = jnp.einsum('bqhd,bkhd->bhqk', q, k) / math.sqrt(Dh)
    mask = jnp.tril(jnp.ones((S, S), bool))
    scores = jnp.where(mask[None, None], scores, -jnp.inf)
    p = jax.nn.softmax(scores, axis=-1)
    o = jnp.einsum('bhqk,bkhd->bqhd', p, v).reshape(B, S, H * Dh)
    return (o @ wo).reshape(B, S, D)


if __name__ == "__main__":
    # ModelArgs-like small config
    dim = 64
    n_heads = 4
    n_kv_heads = 2
    head_dim = dim // n_heads          # 16
    rope_theta = 10000.0
    B, S = 2, 32                       # S=32 with 16-wide tiles -> 2x2 flash grid

    key = jax.random.PRNGKey(0)
    k_x, k_wqkv, k_bqkv, k_wo = jax.random.split(key, 4)

    x = jax.random.normal(k_x, (B, S, dim), dtype=jnp.float32)
    qkv_out = (n_heads + 2 * n_kv_heads) * head_dim
    wqkv = jax.random.normal(k_wqkv, (dim, qkv_out), dtype=jnp.float32) * 0.05
    bqkv = jax.random.normal(k_bqkv, (qkv_out,), dtype=jnp.float32) * 0.05
    wo = jax.random.normal(k_wo, (n_heads * head_dim, dim), dtype=jnp.float32) * 0.05

    # rel_pos = (cos, sin), flash-attn non-interleaved convention: (S, Dh/2)
    inv_freq = 1.0 / (rope_theta ** (jnp.arange(0, head_dim, 2, dtype=jnp.float32) / head_dim))
    pos = jnp.arange(S, dtype=jnp.float32)
    angles = pos[:, None] * inv_freq[None, :]
    cos, sin = jnp.cos(angles), jnp.sin(angles)

    out = attention_forward(x, wqkv, bqkv, wo, cos, sin,
                            n_heads=n_heads, n_kv_heads=n_kv_heads, head_dim=head_dim,
                            q_block=16, kv_block=16)
    out = jax.block_until_ready(out)

    ref = attention_reference(x, wqkv, bqkv, wo, cos, sin,
                              n_heads=n_heads, n_kv_heads=n_kv_heads, head_dim=head_dim)
    assert out.shape == (B, S, dim)
    assert jnp.all(jnp.isfinite(out))
    err = float(jnp.max(jnp.abs(out - ref)))
    assert jnp.allclose(out, ref, rtol=5e-3, atol=5e-3), err

    print("KERNEL_OK")
</pallas_src>

<mosaic_0001>
module attributes {stable_mosaic.version = 11 : i64} {
  func.func @_matmul_bias_kernel(%arg0: i32, %arg1: i32, %arg2: i32, %arg3: memref<64x64xf32, #tpu.memory_space<vmem>>, %arg4: memref<64x128xf32, #tpu.memory_space<vmem>>, %arg5: memref<1x128xf32, #tpu.memory_space<vmem>>, %arg6: memref<64x128xf32, #tpu.memory_space<vmem>>, %arg7: memref<64x128xf32, #tpu.memory_space<vmem>>) attributes {dimension_semantics = [#tpu.dimension_semantics<parallel>, #tpu.dimension_semantics<parallel>, #tpu.dimension_semantics<arbitrary>], iteration_bounds = array<i64: 1, 1, 1>, scalar_prefetch = 0 : i64, scratch_operands = 1 : i64, tpu.core_type = #tpu.core_type<tc>, window_params = [{transform_indices = @transform_0, window_bounds = array<i64: 64, 64>}, {transform_indices = @transform_1, window_bounds = array<i64: 64, 128>}, {transform_indices = @transform_2, window_bounds = array<i64: 1, 128>}, {transform_indices = @transform_3, window_bounds = array<i64: 64, 128>}]} {
    %c0_i32 = arith.constant 0 : i32
    %0 = arith.cmpi eq, %arg2, %c0_i32 : i32
    %1 = arith.extui %0 : i1 to i32
    %c0_i32_0 = arith.constant 0 : i32
    %2 = arith.cmpi ne, %1, %c0_i32_0 : i32
    scf.if %2 {
      %cst_10 = arith.constant 0.000000e+00 : f32
      %12 = vector.broadcast %cst_10 : f32 to vector<64x128xf32>
      %c0_11 = arith.constant 0 : index
      %c0_12 = arith.constant 0 : index
      %13 = vector.load %arg7[%c0_11, %c0_12] : memref<64x128xf32, #tpu.memory_space<vmem>>, vector<64x128xf32>
      tpu.vector_store %arg7[%c0_11, %c0_12], %12 {strides = array<i32>} : memref<64x128xf32, #tpu.memory_space<vmem>>, vector<64x128xf32>,
    } else {
    }
    %c0 = arith.constant 0 : index
    %c0_1 = arith.constant 0 : index
    %3 = vector.load %arg7[%c0, %c0_1] : memref<64x128xf32, #tpu.memory_space<vmem>>, vector<64x128xf32>
    %c0_2 = arith.constant 0 : index
    %c0_3 = arith.constant 0 : index
    %4 = vector.load %arg3[%c0_2, %c0_3] : memref<64x64xf32, #tpu.memory_space<vmem>>, vector<64x64xf32>
    %c0_4 = arith.constant 0 : index
    %c0_5 = arith.constant 0 : index
    %5 = vector.load %arg4[%c0_4, %c0_5] : memref<64x128xf32, #tpu.memory_space<vmem>>, vector<64x128xf32>
    %cst = arith.constant dense<0.000000e+00> : vector<64x128xf32>
    %6 = tpu.matmul %4, %5, %cst {dimension_numbers = #tpu.dot_dimension_numbers<[1], [0], [0], [1], [0, 0, 1, 1], [], []>} : vector<64x64xf32>, vector<64x128xf32>, vector<64x128xf32> -> vector<64x128xf32>
    %7 = arith.addf %3, %6 : vector<64x128xf32>
    %c0_6 = arith.constant 0 : index
    %c0_7 = arith.constant 0 : index
    %8 = vector.load %arg7[%c0_6, %c0_7] : memref<64x128xf32, #tpu.memory_space<vmem>>, vector<64x128xf32>
    tpu.vector_store %arg7[%c0_6, %c0_7], %7 {strides = array<i32>} : memref<64x128xf32, #tpu.memory_space<vmem>>, vector<64x128xf32>,
    %c0_i32_8 = arith.constant 0 : i32
    %9 = arith.cmpi eq, %arg2, %c0_i32_8 : i32
    %10 = arith.extui %9 : i1 to i32
    %c0_i32_9 = arith.constant 0 : i32
    %11 = arith.cmpi ne, %10, %c0_i32_9 : i32
    scf.if %11 {
      %c0_10 = arith.constant 0 : index
      %c0_11 = arith.constant 0 : index
      %12 = vector.load %arg7[%c0_10, %c0_11] : memref<64x128xf32, #tpu.memory_space<vmem>>, vector<64x128xf32>
      %c0_12 = arith.constant 0 : index
      %c0_13 = arith.constant 0 : index
      %13 = vector.load %arg5[%c0_12, %c0_13] : memref<1x128xf32, #tpu.memory_space<vmem>>, vector<1x128xf32>
      %14 = vector.broadcast %13 : vector<1x128xf32> to vector<64x128xf32>
      %15 = arith.addf %12, %14 : vector<64x128xf32>
      %c0_14 = arith.constant 0 : index
      %c0_15 = arith.constant 0 : index
      %16 = vector.load %arg6[%c0_14, %c0_15] : memref<64x128xf32, #tpu.memory_space<vmem>>, vector<64x128xf32>
      tpu.vector_store %arg6[%c0_14, %c0_15], %15 {strides = array<i32>} : memref<64x128xf32, #tpu.memory_space<vmem>>, vector<64x128xf32>,
    } else {
    }
    return
  }
  func.func @transform_0(%arg0: i32, %arg1: i32, %arg2: i32) -> (i32, i32) {
    %c0_i32 = arith.constant 0 : i32
    return %arg0, %arg2 : i32, i32
  }
  func.func @transform_1(%arg0: i32, %arg1: i32, %arg2: i32) -> (i32, i32) {
    %c0_i32 = arith.constant 0 : i32
    return %arg2, %arg1 : i32, i32
  }
  func.func @transform_2(%arg0: i32, %arg1: i32, %arg2: i32) -> (i32, i32) {
    %c0_i32 = arith.constant 0 : i32
    %c0_i32_0 = arith.constant 0 : i32
    return %c0_i32, %arg1 : i32, i32
  }
  func.func @transform_3(%arg0: i32, %arg1: i32, %arg2: i32) -> (i32, i32) {
    %c0_i32 = arith.constant 0 : i32
    return %arg0, %arg1 : i32, i32
  }
}

</mosaic_0001>

<bundles_post_ra>
// kernel: tpu_custom_call.1
= control target key start
LH: loop header
LB: loop body
LE: loop exit
PB: predicated region body
PF: predicated region fallthrough
CT: control target
= control target key end

     0   :  { %8 = vsyncpa [#allocation4], 0  ;;  %s512_s0 = inlined_call_operand.hbm [shape: f32[64,64], index: 0, kind: input, shape index: {}]   ;;  %s513_s1 = inlined_call_operand.hbm [shape: f32[64,128], index: 1, kind: input, shape index: {}]   ;;  %s514_s2 = inlined_call_operand.vmem [shape: f32[1,128], index: 2, kind: input, shape index: {}]   ;;  %s515_s3 = inlined_call_operand.hbm [shape: f32[64,128], index: 3, kind: output, shape index: {}]  }
   0x1   :  { %9 = vsyncpa [#allocation7], 0 }
   0x2   :  { %10 = vsyncpa [#allocation5], 0  ;;  %s431_s12 = smov [#allocation3]   ;;  %s359_s16 = scalar_lea.hbm %s512_s0, 1024 }
   0x3   :  { %s16_s13 = sshll.u32 %s431_s12, 4  ;;  %p360_p0 = scmp.ne.s32.totalorder %s512_s0, %s359_s16  ;;  %s17_s13 = int_to_ptr.vmem [resolvable:$true] %s16_s13 }
   0x4   :  { %p363_p1 = scmp.lt.u32.totalorder %s359_s16, %s512_s0 }
   0x6   :  { %p365_p2 = pnand %p363_p1, %p360_p0 }
   0x8   :  { %368 = shalt.err (!%p365_p2)
}
   0x9   :  { %s369_s21 = scalar_lea.vmem %s17_s13, 1024  ;;  %p374_p4 = scmp.lt.s32.totalorder %s17_s13, %s17_s13 }
   0xa   :  { %p370_p3 = scmp.ne.s32.totalorder %s17_s13, %s369_s21  ;;  %p375_p5 = scmp.lt.s32.totalorder %s369_s21, %s369_s21 }
   0xc   :  { %p376_p6 = por %p375_p5, %p374_p4 }
   0xe   :  { %p377_p7 = pnand %p376_p6, %p370_p3 }
  0x10   :  { %380 = shalt.err (!%p377_p7)
}
  0x11   :  { %s432_s22 = smov 128   ;;  %s433_s23 = smov 8  }
  0x12   :  { %22 = dma.hbm_to_vmem [thread:$0]  %s512_s0, 1024, %s17_s13, [#allocation4], %s432_s22, %s432_s22, %s433_s23  }
  0x13   :  { %s434_s26 = smov [#allocation6]   ;;  %s381_s30 = scalar_lea.hbm %s513_s1, 1024 }
  0x14   :  { %s28_s27 = sshll.u32 %s434_s26, 4  ;;  %p382_p8 = scmp.ne.s32.totalorder %s513_s1, %s381_s30  ;;  %s29_s27 = int_to_ptr.vmem [resolvable:$true] %s28_s27 }
  0x15   :  { %p385_p9 = scmp.lt.u32.totalorder %s381_s30, %s513_s1 }
  0x17   :  { %p387_p10 = pnand %p385_p9, %p382_p8 }
  0x19   :  { %390 = shalt.err (!%p387_p10)
}
  0x1a   :  { %s391_s8 = scalar_lea.vmem %s29_s27, 1024  ;;  %p396_p12 = scmp.lt.s32.totalorder %s29_s27, %s29_s27 }
  0x1b   :  { %p392_p11 = scmp.ne.s32.totalorder %s29_s27, %s391_s8  ;;  %p397_p13 = scmp.lt.s32.totalorder %s391_s8, %s391_s8 }
  0x1d   :  { %p398_p0 = por %p397_p13, %p396_p12 }
  0x1f   :  { %p399_p1 = pnand %p398_p0, %p392_p11 }
  0x21   :  { %402 = shalt.err (!%p399_p1)
}
  0x22   :  { %34 = dma.hbm_to_vmem [thread:$0]  %s513_s1, 1024, %s29_s27, [#allocation7], %s432_s22, %s432_s22, %s433_s23  }
  0x23   :  { %425 = dma.done.wait [#allocation4], 1024  }
  0x24   :  { %426 = vsyncadd [#allocation4], 4294966272 }
  0x25   :  { %427 = dma.done.wait [#allocation7], 1024  }
  0x26   :  { %428 = vsyncadd [#allocation7], 4294966272  ;;  %v71_v0 = vld [vmem:[#allocation6] sm:$0xff]  ;;  %v72_v1 = vld [vmem:[#allocation6 + $0x8] sm:$0xff]  ;;  %vm79_vm0 = vcmask 523264   ;;  %s435_s11 = smov [#allocation8]  }
  0x27   :  { %v73_v2 = vld [vmem:[#allocation6 + $0x10] sm:$0xff]  ;;  %v330_v3 = vpack.c.bf16 %v72_v1, %v71_v0  ;;  %v74_v4 = vld [vmem:[#allocation6 + $0x18] sm:$0xff]  ;;  %v75_v6 = vld [vmem:[#allocation6 + $0x20] sm:$0xff]  ;;  %s264_s12 = sshll.u32 %s435_s11, 4  ;;  %s265_s12 = int_to_ptr.vmem [resolvable:$true] %s264_s12 }
  0x28   :  { %v334_v5 = vpack.c.bf16 %v74_v4, %v73_v2  ;;  %v76_v7 = vld [vmem:[#allocation6 + $0x28] sm:$0xff]  ;;  %v63_v8 = vld [vmem:[#allocation3] sm:$0xff]  ;;  %v77_v11 = vld [vmem:[#allocation6 + $0x30] sm:$0xff]  ;;  %p408_p3 = scmp.lt.s32.totalorder %s265_s12, %s265_s12 }
  0x29   :  { %331 = vmatprep.subr.bf16.mxu0 %v330_v3  ;;  %346 = vmatprep.subr.bf16.mxu1 %v330_v3  ;;  %v67_v9 = vld [vmem:[#allocation3 + $0x20] sm:$0xff]  ;;  %v338_v10 = vpack.c.bf16 %v76_v7, %v75_v6  ;;  %v78_v12 = vld [vmem:[#allocation6 + $0x38] sm:$0xff]  ;;  %v64_v14 = vld [vmem:[#allocation3 + $0x8] sm:$0xff] }
  0x2a   :  { %333 = vmatpush3.bf16.msra.mxu0 %v330_v3  ;;  %350 = vmatpush3.bf16.msra.mxu1 %v330_v3  ;;  %v342_v13 = vpack.c.bf16 %v78_v12, %v77_v11  ;;  %v68_v15 = vld [vmem:[#allocation3 + $0x28] sm:$0xff]  ;;  %v65_v16 = vld [vmem:[#allocation3 + $0x10] sm:$0xff]  ;;  %v66_v18 = vld [vmem:[#allocation3 + $0x18] sm:$0xff] }
  0x2b   :  { %335 = vmatprep.subr.bf16.mxu0 %v334_v5  ;;  %347 = vmatprep.subr.bf16.mxu1 %v334_v5  ;;  %v69_v17 = vld [vmem:[#allocation3 + $0x30] sm:$0xff]  ;;  %v70_v19 = vld [vmem:[#allocation3 + $0x38] sm:$0xff]  ;;  %v285_v20 = vld [vmem:[%s514_s2] ss:$0 sm:$0xff]  ;;  %s403_s2 = scalar_lea.vmem %s265_s12, 1024 }
  0x2c   :  { %318 = vmatprep.mubr.msk.f32.mxu0 %vm79_vm0, %v63_v8  ;;  %324 = vmatprep.mubr.msk.f32.mxu1 %vm79_vm0, %v67_v9  ;;  %p404_p2 = scmp.ne.s32.totalorder %s265_s12, %s403_s2  ;;  %p409_p4 = scmp.lt.s32.totalorder %s403_s2, %s403_s2 }
  0x2e   :  { %337 = vmatpush3.bf16.msra.mxu0 %v334_v5  ;;  %351 = vmatpush3.bf16.msra.mxu1 %v334_v5  ;;  %p410_p5 = por %p409_p4, %p408_p3 }
  0x2f   :  { %339 = vmatprep.subr.bf16.mxu0 %v338_v10  ;;  %348 = vmatprep.subr.bf16.mxu1 %v338_v10 }
  0x30   :  { %p411_p6 = pnand %p410_p5, %p404_p2 }
  0x32   :  { %341 = vmatpush3.bf16.msra.mxu0 %v338_v10  ;;  %352 = vmatpush3.bf16.msra.mxu1 %v338_v10 }
  0x33   :  { %343 = vmatprep.subr.bf16.mxu0 %v342_v13  ;;  %349 = vmatprep.subr.bf16.mxu1 %v342_v13 }
  0x36   :  { %345 = vmatpush3.bf16.msra.mxu0 %v342_v13  ;;  %353 = vmatpush3.bf16.msra.mxu1 %v342_v13 }
  0x39   :  { %319 = vmatmul.mubr.msk.f32.vlgmr.msra.gmra.mrb[0].mxu0 %vm79_vm0, %v64_v14  ;;  %325 = vmatmul.mubr.msk.f32.vlgmr.msra.gmra.mrb[0].mxu1 %vm79_vm0, %v68_v15 }
  0x3a   :  { %321 = vmatprep.mubr.msk.f32.mxu0 %vm79_vm0, %v65_v16  ;;  %327 = vmatprep.mubr.msk.f32.mxu1 %vm79_vm0, %v69_v17 }
  0x3d   :  { %322 = vmatmul.mubr.msk.f32.gmra.mrb[2].mxu0 %vm79_vm0, %v66_v18  ;;  %328 = vmatmul.mubr.msk.f32.gmra.mrb[2].mxu1 %vm79_vm0, %v70_v19 }
 0x10c   :  { %v320_v21 = vpop.f32.mrb[0].mxu0  ;;  %v326_v22 = vpop.f32.mrb[0].mxu1 }
 0x10d   :  { %v244_v23 = vadd.f32 %v320_v21, %v285_v20  ;;  %v248_v24 = vadd.f32 %v326_v22, %v285_v20  ;;  %v170_v25 = vpop.f32.mrb[1].mxu0  ;;  %v190_v26 = vpop.f32.mrb[1].mxu1 }
 0x10e   :  { %v243_v27 = vadd.f32 %v285_v20, %v170_v25  ;;  %v247_v28 = vadd.f32 %v285_v20, %v190_v26 }
 0x10f   :  { %252 = vst [vmem:[#allocation8 + $0x8] sm:$0xff] %v244_v23  ;;  %256 = vst [vmem:[#allocation8 + $0x28] sm:$0xff] %v248_v24 }
 0x110   :  { %251 = vst [vmem:[#allocation8] sm:$0xff] %v243_v27  ;;  %255 = vst [vmem:[#allocation8 + $0x20] sm:$0xff] %v247_v28  ;;  %v323_v29 = vpop.f32.mrb[2].mxu0  ;;  %v329_v30 = vpop.f32.mrb[2].mxu1 }
 0x111   :  { %v246_v31 = vadd.f32 %v323_v29, %v285_v20  ;;  %v250_v32 = vadd.f32 %v329_v30, %v285_v20  ;;  %v180_v33 = vpop.f32.mrb[3].mxu0  ;;  %v200_v34 = vpop.f32.mrb[3].mxu1 }
 0x112   :  { %v245_v35 = vadd.f32 %v285_v20, %v180_v33  ;;  %v249_v36 = vadd.f32 %v285_v20, %v200_v34 }
 0x113   :  { %254 = vst [vmem:[#allocation8 + $0x18] sm:$0xff] %v246_v31  ;;  %258 = vst [vmem:[#allocation8 + $0x38] sm:$0xff] %v250_v32 }
 0x114   :  { %253 = vst [vmem:[#allocation8 + $0x10] sm:$0xff] %v245_v35  ;;  %257 = vst [vmem:[#allocation8 + $0x30] sm:$0xff] %v249_v36 }
 0x115   :  { %414 = shalt.err (!%p411_p6)
}
 0x116   :  { %s415_s15 = scalar_lea.hbm %s515_s3, 1024 }
 0x117   :  { %p416_p7 = scmp.ne.s32.totalorder %s515_s3, %s415_s15  ;;  %p419_p8 = scmp.lt.u32.totalorder %s415_s15, %s515_s3 }
 0x119   :  { %p421_p9 = pnand %p419_p8, %p416_p7 }
 0x11b   :  { %424 = shalt.err (!%p421_p9)
}
 0x11c   :  { %270 = dma.vmem_to_hbm [thread:$0]  %s265_s12, 1024, %s515_s3, [#allocation5], %s432_s22, %s432_s22, %s433_s23  }
 0x11d   :  { %429 = dma.done.wait [#allocation5], 1024  }
 0x11e   :  { %430 = vsyncadd [#allocation5], 4294966272 }
 0x11f   :  { %274 = vsyncpa [#allocation4], 1 }
 0x120   :  { %275 = vsyncpa [#allocation7], 1 }
 0x121   :  { %276 = vsyncpa [#allocation5], 1 }

</bundles_post_ra>
